<compile_context>
chip_gen: v6e
topology: v6e:2x2x1
jax: 0.10.0
libtpu: 0.0.40
codegen_flags: <defaults>
</compile_context>

<pallas_src>
import functools

import jax
import jax.numpy as jnp
from jax.experimental import pallas as pl
from jax.experimental.pallas import tpu as pltpu

# ---------------- problem sizes (small, consistent with the module) -----------
B = 2          # batch
C = 4          # input channels
H = 16         # spatial
W = 16
D = C * H * W  # flattened input features = 1024
HIDDEN = 32    # backbone hidden width
N_ATTR = 8     # number of concept/attribute heads (each emits 1 logit)
N_CLASSES = 4  # stage-2 label predictor output classes
OUT_W = 128    # combined lane-dense output width (multiple of 128 -> unmasked vst)


def _round_up(x, m):
    return (x + m - 1) // m * m


def _e2e_kernel(x_ref, w1_ref, b1_ref, wh_ref, bh_ref, w2_ref, b2_ref,
                out_ref, *, use_relu, use_sigmoid):
    """Fused End2End forward for one batch tile.

    x_ref:   [TB, D]            f32   flattened NCHW input tile
    w1_ref:  [D, HIDDEN]        bf16  backbone weight (dominant DMA, halved)
    b1_ref:  [1, HIDDEN]        f32
    wh_ref:  [HIDDEN, N_ATTR]   f32   all concept heads stacked column-wise
    bh_ref:  [1, N_ATTR]        f32
    w2_ref:  [N_ATTR, N_CLASSES]f32   sec_model weight
    b2_ref:  [1, N_CLASSES]     f32
    out_ref: [TB, OUT_W]        f32   combined output:
             [:, :N_CLASSES]                  = class logits
             [:, N_CLASSES:N_CLASSES+N_ATTR]  = concept logits (stage1 out)
    """
    # Backbone: the only matmul with real work — bf16 on the MXU, f32 accumulate.
    x = x_ref[...].astype(jnp.bfloat16)
    h = jnp.dot(x, w1_ref[...], preferred_element_type=jnp.float32)
    h = jnp.maximum(h + b1_ref[...], 0.0)                      # [TB, HIDDEN]

    # Concept heads (== torch.cat(stage1_out, dim=1)).
    # NOTE: kept as jnp.dot (MXU) instead of a VPU broadcast+reduce: the VPU
    # formulation needs lane<->sublane relayouts that are riskier to lower and
    # this matmul is tiny next to the w1 DMA that dominates the kernel.
    concepts = (jnp.dot(h, wh_ref[...], preferred_element_type=jnp.float32)
                + bh_ref[...])                                  # [TB, N_ATTR]

    # forward_stage2 activation (static; ReLU wins if both flags set, as in torch)
    if use_relu:
        attr = jnp.maximum(concepts, 0.0)
    elif use_sigmoid:
        attr = jax.nn.sigmoid(concepts)
    else:
        attr = concepts

    # sec_model: Linear(N_ATTR, N_CLASSES)
    class_logits = (jnp.dot(attr, w2_ref[...], preferred_element_type=jnp.float32)
                    + b2_ref[...])                              # [TB, N_CLASSES]

    # Single lane-dense combined output tile (zero the pad lanes so the full
    # 128-wide slab is defined, then drop the two small results in place).
    out_ref[...] = jnp.zeros_like(out_ref)
    out_ref[:, 0:N_CLASSES] = class_logits
    out_ref[:, N_CLASSES:N_CLASSES + N_ATTR] = concepts


def end2end_forward(x_nchw, params, *, use_relu=False, use_sigmoid=True):
    """Eval-mode End2EndModel.forward.

    Returns [class_logits, c_0, ..., c_{A-1}] where c_i is the i-th concept
    head output of shape [B, 1] (matches the PyTorch list structure)."""
    b = x_nchw.shape[0]
    x_flat = x_nchw.reshape(b, -1).astype(jnp.float32)  # row-major NCHW flatten

    # Batch tiling: grid over batch so the same kernel amortizes weight DMA at
    # large B and the batch axis can be split across v7x TensorCores.
    tb = min(128, _round_up(b, 8))
    b_pad = _round_up(b, tb)
    if b_pad != b:
        x_flat = jnp.pad(x_flat, ((0, b_pad - b), (0, 0)))

    kernel = functools.partial(_e2e_kernel,
                               use_relu=use_relu, use_sigmoid=use_sigmoid)

    flops = 2 * b_pad * (D * HIDDEN + HIDDEN * N_ATTR + N_ATTR * N_CLASSES)
    transcendentals = b_pad * N_ATTR if (use_sigmoid and not use_relu) else 0
    bytes_accessed = (x_flat.size * 4                 # x (f32)
                      + D * HIDDEN * 2                # w1 (bf16)
                      + (HIDDEN + N_ATTR + N_CLASSES) * 4
                      + HIDDEN * N_ATTR * 4 + N_ATTR * N_CLASSES * 4
                      + b_pad * OUT_W * 4)            # combined output

    combined = pl.pallas_call(
        kernel,
        out_shape=jax.ShapeDtypeStruct((b_pad, OUT_W), jnp.float32),
        grid=(b_pad // tb,),
        in_specs=[
            pl.BlockSpec((tb, D), lambda i: (i, 0)),              # x (per batch tile)
            pl.BlockSpec((D, HIDDEN), lambda i: (0, 0)),          # w1 (resident)
            pl.BlockSpec((1, HIDDEN), lambda i: (0, 0)),          # b1
            pl.BlockSpec((HIDDEN, N_ATTR), lambda i: (0, 0)),     # wh
            pl.BlockSpec((1, N_ATTR), lambda i: (0, 0)),          # bh
            pl.BlockSpec((N_ATTR, N_CLASSES), lambda i: (0, 0)),  # w2
            pl.BlockSpec((1, N_CLASSES), lambda i: (0, 0)),       # b2
        ],
        out_specs=pl.BlockSpec((tb, OUT_W), lambda i: (i, 0)),
        compiler_params=pltpu.CompilerParams(
            dimension_semantics=("parallel",)),
        cost_estimate=pl.CostEstimate(
            flops=flops,
            transcendentals=transcendentals,
            bytes_accessed=bytes_accessed),
    )(x_flat, params["w1"], params["b1"], params["wh"], params["bh"],
      params["w2"], params["b2"])

    class_logits = combined[:b, :N_CLASSES]
    concept_logits = combined[:b, N_CLASSES:N_CLASSES + N_ATTR]
    # Single split op (not 8 per-column slices) to preserve the PyTorch list API.
    stage1_out = jnp.split(concept_logits, N_ATTR, axis=1)
    return [class_logits] + list(stage1_out)


def init_params(key):
    ks = jax.random.split(key, 6)
    scale = 0.05
    return {
        # bf16 backbone weight: halves the dominant HBM->VMEM DMA; MXU is
        # bf16-native on v5e/v6e/v7x and accumulation stays f32.
        "w1": (scale * jax.random.normal(ks[0], (D, HIDDEN), jnp.float32)
               ).astype(jnp.bfloat16),
        "b1": scale * jax.random.normal(ks[1], (1, HIDDEN), jnp.float32),
        "wh": scale * jax.random.normal(ks[2], (HIDDEN, N_ATTR), jnp.float32),
        "bh": scale * jax.random.normal(ks[3], (1, N_ATTR), jnp.float32),
        "w2": scale * jax.random.normal(ks[4], (N_ATTR, N_CLASSES), jnp.float32),
        "b2": scale * jax.random.normal(ks[5], (1, N_CLASSES), jnp.float32),
    }


if __name__ == "__main__":
    key = jax.random.PRNGKey(0)
    kx, kp = jax.random.split(key)
    x = jax.random.normal(kx, (B, C, H, W), jnp.float32)
    params = init_params(kp)

    outs = end2end_forward(x, params, use_relu=False, use_sigmoid=True)
    outs = jax.block_until_ready(outs)

    # Pure-JAX reference (mirrors the kernel's bf16 quantization of x and w1).
    x_flat = x.reshape(B, -1)
    x_bf = x_flat.astype(jnp.bfloat16).astype(jnp.float32)
    w1_f32 = params["w1"].astype(jnp.float32)
    h_ref = jnp.maximum(x_bf @ w1_f32 + params["b1"], 0.0)
    concepts_ref = h_ref @ params["wh"] + params["bh"]
    class_ref = jax.nn.sigmoid(concepts_ref) @ params["w2"] + params["b2"]

    assert outs[0].shape == (B, N_CLASSES)
    assert len(outs) == 1 + N_ATTR and all(o.shape == (B, 1) for o in outs[1:])
    assert jnp.allclose(outs[0], class_ref, atol=1e-3), \
        float(jnp.max(jnp.abs(outs[0] - class_ref)))
    assert jnp.allclose(jnp.concatenate(outs[1:], axis=1), concepts_ref, atol=1e-3), \
        float(jnp.max(jnp.abs(jnp.concatenate(outs[1:], axis=1) - concepts_ref)))

    print("KERNEL_OK")
</pallas_src>

<mosaic_0001>
module attributes {stable_mosaic.version = 11 : i64} {
  func.func @_e2e_kernel(%arg0: i32, %arg1: memref<8x1024xf32, #tpu.memory_space<vmem>>, %arg2: memref<1024x32xbf16, #tpu.memory_space<vmem>>, %arg3: memref<1x32xf32, #tpu.memory_space<vmem>>, %arg4: memref<32x8xf32, #tpu.memory_space<vmem>>, %arg5: memref<1x8xf32, #tpu.memory_space<vmem>>, %arg6: memref<8x4xf32, #tpu.memory_space<vmem>>, %arg7: memref<1x4xf32, #tpu.memory_space<vmem>>, %arg8: memref<8x128xf32, #tpu.memory_space<vmem>>) attributes {dimension_semantics = [#tpu.dimension_semantics<parallel>], iteration_bounds = array<i64: 1>, scalar_prefetch = 0 : i64, scratch_operands = 0 : i64, tpu.core_type = #tpu.core_type<tc>, window_params = [{transform_indices = @transform_0, window_bounds = array<i64: 8, 1024>}, {pipeline_mode = #tpu.pipeline_mode<synchronous>, transform_indices = @transform_1, window_bounds = array<i64: 1024, 32>}, {pipeline_mode = #tpu.pipeline_mode<synchronous>, transform_indices = @transform_2, window_bounds = array<i64: 1, 32>}, {pipeline_mode = #tpu.pipeline_mode<synchronous>, transform_indices = @transform_3, window_bounds = array<i64: 32, 8>}, {pipeline_mode = #tpu.pipeline_mode<synchronous>, transform_indices = @transform_4, window_bounds = array<i64: 1, 8>}, {pipeline_mode = #tpu.pipeline_mode<synchronous>, transform_indices = @transform_5, window_bounds = array<i64: 8, 4>}, {pipeline_mode = #tpu.pipeline_mode<synchronous>, transform_indices = @transform_6, window_bounds = array<i64: 1, 4>}, {transform_indices = @transform_7, window_bounds = array<i64: 8, 128>}]} {
    %c0 = arith.constant 0 : index
    %c0_0 = arith.constant 0 : index
    %0 = vector.load %arg1[%c0, %c0_0] : memref<8x1024xf32, #tpu.memory_space<vmem>>, vector<8x1024xf32>
    %1 = arith.truncf %0 : vector<8x1024xf32> to vector<8x1024xbf16>
    %c0_1 = arith.constant 0 : index
    %c0_2 = arith.constant 0 : index
    %2 = vector.load %arg2[%c0_1, %c0_2] : memref<1024x32xbf16, #tpu.memory_space<vmem>>, vector<1024x32xbf16>
    %cst = arith.constant dense<0.000000e+00> : vector<8x32xf32>
    %3 = tpu.matmul %1, %2, %cst {dimension_numbers = #tpu.dot_dimension_numbers<[1], [0], [0], [1], [0, 0, 1, 1], [], []>} : vector<8x1024xbf16>, vector<1024x32xbf16>, vector<8x32xf32> -> vector<8x32xf32>
    %c0_3 = arith.constant 0 : index
    %c0_4 = arith.constant 0 : index
    %4 = vector.load %arg3[%c0_3, %c0_4] : memref<1x32xf32, #tpu.memory_space<vmem>>, vector<1x32xf32>
    %5 = vector.broadcast %4 : vector<1x32xf32> to vector<8x32xf32>
    %6 = arith.addf %3, %5 : vector<8x32xf32>
    %cst_5 = arith.constant 0.000000e+00 : f32
    %7 = vector.broadcast %cst_5 : f32 to vector<8x32xf32>
    %8 = arith.maximumf %6, %7 : vector<8x32xf32>
    %c0_6 = arith.constant 0 : index
    %c0_7 = arith.constant 0 : index
    %9 = vector.load %arg4[%c0_6, %c0_7] : memref<32x8xf32, #tpu.memory_space<vmem>>, vector<32x8xf32>
    %cst_8 = arith.constant dense<0.000000e+00> : vector<8x8xf32>
    %10 = tpu.matmul %8, %9, %cst_8 {dimension_numbers = #tpu.dot_dimension_numbers<[1], [0], [0], [1], [0, 0, 1, 1], [], []>} : vector<8x32xf32>, vector<32x8xf32>, vector<8x8xf32> -> vector<8x8xf32>
    %c0_9 = arith.constant 0 : index
    %c0_10 = arith.constant 0 : index
    %11 = vector.load %arg5[%c0_9, %c0_10] : memref<1x8xf32, #tpu.memory_space<vmem>>, vector<1x8xf32>
    %12 = vector.broadcast %11 : vector<1x8xf32> to vector<8x8xf32>
    %13 = arith.addf %10, %12 : vector<8x8xf32>
    %14 = arith.negf %13 : vector<8x8xf32>
    %15 = math.exp %14 : vector<8x8xf32>
    %cst_11 = arith.constant 1.000000e+00 : f32
    %16 = vector.broadcast %cst_11 : f32 to vector<8x8xf32>
    %17 = arith.addf %16, %15 : vector<8x8xf32>
    %18 = arith.divf %16, %17 : vector<8x8xf32>
    %c0_12 = arith.constant 0 : index
    %c0_13 = arith.constant 0 : index
    %19 = vector.load %arg6[%c0_12, %c0_13] : memref<8x4xf32, #tpu.memory_space<vmem>>, vector<8x4xf32>
    %cst_14 = arith.constant dense<0.000000e+00> : vector<8x4xf32>
    %20 = tpu.matmul %18, %19, %cst_14 {dimension_numbers = #tpu.dot_dimension_numbers<[1], [0], [0], [1], [0, 0, 1, 1], [], []>} : vector<8x8xf32>, vector<8x4xf32>, vector<8x4xf32> -> vector<8x4xf32>
    %c0_15 = arith.constant 0 : index
    %c0_16 = arith.constant 0 : index
    %21 = vector.load %arg7[%c0_15, %c0_16] : memref<1x4xf32, #tpu.memory_space<vmem>>, vector<1x4xf32>
    %22 = vector.broadcast %21 : vector<1x4xf32> to vector<8x4xf32>
    %23 = arith.addf %20, %22 : vector<8x4xf32>
    %cst_17 = arith.constant 0.000000e+00 : f32
    %24 = vector.broadcast %cst_17 : f32 to vector<8x128xf32>
    %c0_18 = arith.constant 0 : index
    %c0_19 = arith.constant 0 : index
    %25 = vector.load %arg8[%c0_18, %c0_19] : memref<8x128xf32, #tpu.memory_space<vmem>>, vector<8x128xf32>
    tpu.vector_store %arg8[%c0_18, %c0_19], %24 {strides = array<i32>} : memref<8x128xf32, #tpu.memory_space<vmem>>, vector<8x128xf32>,
    %c0_20 = arith.constant 0 : index
    %c0_21 = arith.constant 0 : index
    %26 = vector.load %arg8[%c0_20, %c0_21] : memref<8x128xf32, #tpu.memory_space<vmem>>, vector<8x4xf32>
    tpu.vector_store %arg8[%c0_20, %c0_21], %23 {strides = array<i32>} : memref<8x128xf32, #tpu.memory_space<vmem>>, vector<8x4xf32>,
    %c0_22 = arith.constant 0 : index
    %c4 = arith.constant 4 : index
    %27 = vector.load %arg8[%c0_22, %c4] : memref<8x128xf32, #tpu.memory_space<vmem>>, vector<8x8xf32>
    tpu.vector_store %arg8[%c0_22, %c4], %13 {strides = array<i32>} : memref<8x128xf32, #tpu.memory_space<vmem>>, vector<8x8xf32>,
    return
  }
  func.func @transform_0(%arg0: i32) -> (i32, i32) {
    %c0_i32 = arith.constant 0 : i32
    %c0_i32_0 = arith.constant 0 : i32
    return %arg0, %c0_i32 : i32, i32
  }
  func.func @transform_1(%arg0: i32) -> (i32, i32) {
    %c0_i32 = arith.constant 0 : i32
    %c0_i32_0 = arith.constant 0 : i32
    %c0_i32_1 = arith.constant 0 : i32
    return %c0_i32, %c0_i32_0 : i32, i32
  }
  func.func @transform_2(%arg0: i32) -> (i32, i32) {
    %c0_i32 = arith.constant 0 : i32
    %c0_i32_0 = arith.constant 0 : i32
    %c0_i32_1 = arith.constant 0 : i32
    return %c0_i32, %c0_i32_0 : i32, i32
  }
  func.func @transform_3(%arg0: i32) -> (i32, i32) {
    %c0_i32 = arith.constant 0 : i32
    %c0_i32_0 = arith.constant 0 : i32
    %c0_i32_1 = arith.constant 0 : i32
    return %c0_i32, %c0_i32_0 : i32, i32
  }
  func.func @transform_4(%arg0: i32) -> (i32, i32) {
    %c0_i32 = arith.constant 0 : i32
    %c0_i32_0 = arith.constant 0 : i32
    %c0_i32_1 = arith.constant 0 : i32
    return %c0_i32, %c0_i32_0 : i32, i32
  }
  func.func @transform_5(%arg0: i32) -> (i32, i32) {
    %c0_i32 = arith.constant 0 : i32
    %c0_i32_0 = arith.constant 0 : i32
    %c0_i32_1 = arith.constant 0 : i32
    return %c0_i32, %c0_i32_0 : i32, i32
  }
  func.func @transform_6(%arg0: i32) -> (i32, i32) {
    %c0_i32 = arith.constant 0 : i32
    %c0_i32_0 = arith.constant 0 : i32
    %c0_i32_1 = arith.constant 0 : i32
    return %c0_i32, %c0_i32_0 : i32, i32
  }
  func.func @transform_7(%arg0: i32) -> (i32, i32) {
    %c0_i32 = arith.constant 0 : i32
    %c0_i32_0 = arith.constant 0 : i32
    return %arg0, %c0_i32 : i32, i32
  }
}

</mosaic_0001>

<bundles_post_ra>
// kernel: tpu_custom_call.1
= control target key start
LH: loop header
LB: loop body
LE: loop exit
PB: predicated region body
PF: predicated region fallthrough
CT: control target
= control target key end

     0   :  { %s1482_s0 = inlined_call_operand.vmem [shape: f32[8,1024], index: 0, kind: input, shape index: {}]   ;;  %s1483_s1 = inlined_call_operand.vmem [shape: bf16[1024,32], index: 1, kind: input, shape index: {}]   ;;  %s1484_s2 = inlined_call_operand.vmem [shape: f32[1,32], index: 2, kind: input, shape index: {}]   ;;  %s1485_s3 = inlined_call_operand.vmem [shape: f32[32,8], index: 3, kind: input, shape index: {}]   ;;  %s1486_s4 = inlined_call_operand.vmem [shape: f32[1,8], index: 4, kind: input, shape index: {}]   ;;  %s1487_s5 = inlined_call_operand.vmem [shape: f32[8,4], index: 5, kind: input, shape index: {}]   ;;  %s1488_s6 = inlined_call_operand.vmem [shape: f32[1,4], index: 6, kind: input, shape index: {}]   ;;  %s1489_s7 = inlined_call_operand.hbm [shape: f32[8,128], index: 7, kind: output, shape index: {}]  }
   0x1   :  { %v1105_v0 = vld [vmem:[%s1483_s1 + $0x78] sm:$0xff]   ;;  %v1109_v4 = vld [vmem:[%s1483_s1 + $0x70] sm:$0xff]   ;;  %v1113_v8 = vld [vmem:[%s1483_s1 + $0x68] sm:$0xff]  }
   0x2   :  { %v1106_v1 = vld [vmem:[%s1483_s1 + $0xf8] sm:$0xff]   ;;  %990 = vmatprep.subr.bf16.mxu0 %v1105_v0  ;;  %v1110_v5 = vld [vmem:[%s1483_s1 + $0xf0] sm:$0xff]   ;;  %v1114_v9 = vld [vmem:[%s1483_s1 + $0xe8] sm:$0xff]  }
   0x3   :  { %v1107_v2 = vld [vmem:[%s1483_s1 + $0x38] sm:$0xff]   ;;  %1012 = vmatprep.subr.bf16.mxu1 %v1106_v1  ;;  %v1111_v6 = vld [vmem:[%s1483_s1 + $0x30] sm:$0xff]   ;;  %v1115_v10 = vld [vmem:[%s1483_s1 + $0x28] sm:$0xff]  }
   0x4   :  { %v1108_v3 = vld [vmem:[%s1483_s1 + $0xb8] sm:$0xff]   ;;  %991 = vmatpush3.bf16.msra.mxu0 %v1107_v2  ;;  %v1112_v7 = vld [vmem:[%s1483_s1 + $0xb0] sm:$0xff]   ;;  %v1116_v11 = vld [vmem:[%s1483_s1 + $0xa8] sm:$0xff]  }
   0x5   :  { %1013 = vmatpush3.bf16.msra.mxu1 %v1108_v3  ;;  %992 = vmatprep.subr.bf16.mxu0 %v1109_v4  ;;  %v1117_v12 = vld [vmem:[%s1483_s1 + $0x60] sm:$0xff]   ;;  %v1121_v16 = vld [vmem:[%s1483_s1 + $0x58] sm:$0xff]   ;;  %v1125_v20 = vld [vmem:[%s1483_s1 + $0x50] sm:$0xff]  }
   0x6   :  { %1014 = vmatprep.subr.bf16.mxu1 %v1110_v5  ;;  %v1118_v13 = vld [vmem:[%s1483_s1 + $0xe0] sm:$0xff]   ;;  %v1122_v17 = vld [vmem:[%s1483_s1 + $0xd8] sm:$0xff]   ;;  %v1126_v21 = vld [vmem:[%s1483_s1 + $0xd0] sm:$0xff]  }
   0x7   :  { %v1119_v14 = vld [vmem:[%s1483_s1 + $0x20] sm:$0xff]   ;;  %v1123_v18 = vld [vmem:[%s1483_s1 + $0x18] sm:$0xff]   ;;  %v1127_v22 = vld [vmem:[%s1483_s1 + $0x10] sm:$0xff]  }
   0x8   :  { %993 = vmatpush3.bf16.msra.mxu0 %v1111_v6  ;;  %v1120_v15 = vld [vmem:[%s1483_s1 + $0xa0] sm:$0xff]   ;;  %v1124_v19 = vld [vmem:[%s1483_s1 + $0x98] sm:$0xff]   ;;  %v1128_v23 = vld [vmem:[%s1483_s1 + $0x90] sm:$0xff]  }
   0x9   :  { %1015 = vmatpush3.bf16.msra.mxu1 %v1112_v7  ;;  %994 = vmatprep.subr.bf16.mxu0 %v1113_v8  ;;  %v1129_v24 = vld [vmem:[%s1483_s1 + $0x48] sm:$0xff]   ;;  %v1133_v28 = vld [vmem:[%s1483_s1 + $0x40] sm:$0xff]   ;;  %v31_v33 = vld [vmem:[%s1482_s0 + $0x18] sm:$0xff] }
   0xa   :  { %1016 = vmatprep.subr.bf16.mxu1 %v1114_v9  ;;  %v1130_v25 = vld [vmem:[%s1483_s1 + $0xc8] sm:$0xff]   ;;  %v1134_v29 = vld [vmem:[%s1483_s1 + $0xc0] sm:$0xff]   ;;  %v39_v36 = vpack.c.bf16 %v31_v33, %v31_v33  ;;  %v30_v38 = vld [vmem:[%s1482_s0 + $0x10] sm:$0xff] }
   0xb   :  { %v1131_v26 = vld [vmem:[%s1483_s1 + $0x8] sm:$0xff]   ;;  %v1135_v30 = vld [vmem:[%s1483_s1] sm:$0xff]   ;;  %v38_v39 = vpack.c.bf16 %v30_v38, %v30_v38  ;;  %v1137_v40 = vld [vmem:[%s1483_s1 + $0x178] sm:$0xff]  }
   0xc   :  { %995 = vmatpush3.bf16.msra.mxu0 %v1115_v10  ;;  %v1132_v27 = vld [vmem:[%s1483_s1 + $0x88] sm:$0xff]   ;;  %v1136_v31 = vld [vmem:[%s1483_s1 + $0x80] sm:$0xff]   ;;  %635 = vmatprep.mubr.bf16.mxu1 %v39_v36  ;;  %v1138_v41 = vld [vmem:[%s1483_s1 + $0x1f8] sm:$0xff]  }
   0xd   :  { %1017 = vmatpush3.bf16.msra.mxu1 %v1116_v11  ;;  %996 = vmatprep.subr.bf16.mxu0 %v1117_v12  ;;  %v29_v32 = vld [vmem:[%s1482_s0 + $0x8] sm:$0xff]  ;;  %v28_v34 = vld [vmem:[%s1482_s0] sm:$0xff]  ;;  %v1139_v42 = vld [vmem:[%s1483_s1 + $0x138] sm:$0xff]  }
   0xe   :  { %1018 = vmatprep.subr.bf16.mxu1 %v1118_v13  ;;  %v37_v35 = vpack.c.bf16 %v29_v32, %v29_v32  ;;  %v36_v37 = vpack.c.bf16 %v28_v34, %v28_v34  ;;  %v1140_v43 = vld [vmem:[%s1483_s1 + $0x1b8] sm:$0xff]   ;;  %v1141_v44 = vld [vmem:[%s1483_s1 + $0x170] sm:$0xff]   ;;  %v1145_v48 = vld [vmem:[%s1483_s1 + $0x168] sm:$0xff]  }
   0xf   :  { %v1142_v45 = vld [vmem:[%s1483_s1 + $0x1f0] sm:$0xff]   ;;  %v1146_v49 = vld [vmem:[%s1483_s1 + $0x1e8] sm:$0xff]   ;;  %v1149_v52 = vld [vmem:[%s1483_s1 + $0x160] sm:$0xff]  }
  0x10   :  { %997 = vmatpush3.bf16.msra.mxu0 %v1119_v14  ;;  %595 = vmatprep.mubr.bf16.mxu0 %v37_v35  ;;  %v1143_v46 = vld [vmem:[%s1483_s1 + $0x130] sm:$0xff]   ;;  %v1147_v50 = vld [vmem:[%s1483_s1 + $0x128] sm:$0xff]   ;;  %v1150_v53 = vld [vmem:[%s1483_s1 + $0x1e0] sm:$0xff]  }
  0x11   :  { %1019 = vmatpush3.bf16.msra.mxu1 %v1120_v15  ;;  %998 = vmatprep.subr.bf16.mxu0 %v1121_v16  ;;  %v1144_v47 = vld [vmem:[%s1483_s1 + $0x1b0] sm:$0xff]   ;;  %v1148_v51 = vld [vmem:[%s1483_s1 + $0x1a8] sm:$0xff]   ;;  %v1151_v54 = vld [vmem:[%s1483_s1 + $0x120] sm:$0xff]  }
  0x12   :  { %1020 = vmatprep.subr.bf16.mxu1 %v1122_v17  ;;  %v1152_v55 = vld [vmem:[%s1483_s1 + $0x1a0] sm:$0xff]   ;;  %v1153_v56 = vld [vmem:[%s1483_s1 + $0x158] sm:$0xff]   ;;  %v1157_v60 = vld [vmem:[%s1483_s1 + $0x150] sm:$0xff]  }
  0x13   :  { %v1154_v57 = vld [vmem:[%s1483_s1 + $0x1d8] sm:$0xff]   ;;  %v1158_v61 = vld [vmem:[%s1483_s1 + $0x1d0] sm:$0xff]   ;;  %v1161_v0 = vld [vmem:[%s1483_s1 + $0x148] sm:$0xff]  }
  0x14   :  { %999 = vmatpush3.bf16.msra.mxu0 %v1123_v18  ;;  %v1155_v58 = vld [vmem:[%s1483_s1 + $0x118] sm:$0xff]   ;;  %v1159_v62 = vld [vmem:[%s1483_s1 + $0x110] sm:$0xff]   ;;  %v1162_v1 = vld [vmem:[%s1483_s1 + $0x1c8] sm:$0xff]  }
  0x15   :  { %1021 = vmatpush3.bf16.msra.mxu1 %v1124_v19  ;;  %1000 = vmatprep.subr.bf16.mxu0 %v1125_v20  ;;  %v1156_v59 = vld [vmem:[%s1483_s1 + $0x198] sm:$0xff]   ;;  %v1160_v63 = vld [vmem:[%s1483_s1 + $0x190] sm:$0xff]   ;;  %v1163_v2 = vld [vmem:[%s1483_s1 + $0x108] sm:$0xff]  }
  0x16   :  { %1022 = vmatprep.subr.bf16.mxu1 %v1126_v21  ;;  %v1164_v3 = vld [vmem:[%s1483_s1 + $0x188] sm:$0xff]   ;;  %v1165_v4 = vld [vmem:[%s1483_s1 + $0x140] sm:$0xff]   ;;  %v35_v9 = vld [vmem:[%s1482_s0 + $0x38] sm:$0xff] }
  0x17   :  { %v1166_v5 = vld [vmem:[%s1483_s1 + $0x1c0] sm:$0xff]   ;;  %v33_v8 = vld [vmem:[%s1482_s0 + $0x28] sm:$0xff]  ;;  %v43_v11 = vpack.c.bf16 %v35_v9, %v35_v9  ;;  %v34_v13 = vld [vmem:[%s1482_s0 + $0x30] sm:$0xff] }
  0x18   :  { %1001 = vmatpush3.bf16.msra.mxu0 %v1127_v22  ;;  %v1167_v6 = vld [vmem:[%s1483_s1 + $0x100] sm:$0xff]   ;;  %v41_v10 = vpack.c.bf16 %v33_v8, %v33_v8 }
  0x19   :  { %1023 = vmatpush3.bf16.msra.mxu1 %v1128_v23  ;;  %1002 = vmatprep.subr.bf16.mxu0 %v1129_v24  ;;  %v1168_v7 = vld [vmem:[%s1483_s1 + $0x180] sm:$0xff]  }
  0x1a   :  { %1024 = vmatprep.subr.bf16.mxu1 %v1130_v25  ;;  %v32_v12 = vld [vmem:[%s1482_s0 + $0x20] sm:$0xff] }
  0x1c   :  { %1003 = vmatpush3.bf16.msra.mxu0 %v1131_v26 }
  0x1d   :  { %1025 = vmatpush3.bf16.msra.mxu1 %v1132_v27  ;;  %1004 = vmatprep.subr.bf16.mxu0 %v1133_v28 }
  0x1e   :  { %1026 = vmatprep.subr.bf16.mxu1 %v1134_v29 }
  0x20   :  { %1005 = vmatpush3.bf16.msra.mxu0 %v1135_v30 }
  0x21   :  { %1027 = vmatpush3.bf16.msra.mxu1 %v1136_v31  ;;  %1034 = vmatprep.subr.bf16.mxu0 %v1137_v40 }
  0x22   :  { %1056 = vmatprep.subr.bf16.mxu1 %v1138_v41 }
  0x23   :  { %596 = vmatmul.mubr.bf16.vlgmr.msra.gmra.mxu0 %v36_v37 }
  0x24   :  { %636 = vmatmul.mubr.bf16.vlgmr.msra.gmra.mxu1 %v38_v39  ;;  %1035 = vmatpush3.bf16.msra.mxu0 %v1139_v42 }
  0x25   :  { %1057 = vmatpush3.bf16.msra.mxu1 %v1140_v43  ;;  %1036 = vmatprep.subr.bf16.mxu0 %v1141_v44 }
  0x26   :  { %1058 = vmatprep.subr.bf16.mxu1 %v1142_v45 }
  0x28   :  { %1037 = vmatpush3.bf16.msra.mxu0 %v1143_v46 }
  0x29   :  { %1059 = vmatpush3.bf16.msra.mxu1 %v1144_v47  ;;  %1038 = vmatprep.subr.bf16.mxu0 %v1145_v48 }
  0x2a   :  { %1060 = vmatprep.subr.bf16.mxu1 %v1146_v49 }
  0x2c   :  { %1039 = vmatpush3.bf16.msra.mxu0 %v1147_v50 }
  0x2d   :  { %1061 = vmatpush3.bf16.msra.mxu1 %v1148_v51  ;;  %1040 = vmatprep.subr.bf16.mxu0 %v1149_v52 }
  0x2e   :  { %1062 = vmatprep.subr.bf16.mxu1 %v1150_v53 }
  0x30   :  { %1041 = vmatpush3.bf16.msra.mxu0 %v1151_v54 }
  0x31   :  { %1063 = vmatpush3.bf16.msra.mxu1 %v1152_v55  ;;  %1042 = vmatprep.subr.bf16.mxu0 %v1153_v56 }
  0x32   :  { %1064 = vmatprep.subr.bf16.mxu1 %v1154_v57 }
  0x34   :  { %1043 = vmatpush3.bf16.msra.mxu0 %v1155_v58 }
  0x35   :  { %1065 = vmatpush3.bf16.msra.mxu1 %v1156_v59  ;;  %1044 = vmatprep.subr.bf16.mxu0 %v1157_v60 }
  0x36   :  { %1066 = vmatprep.subr.bf16.mxu1 %v1158_v61 }
  0x38   :  { %1045 = vmatpush3.bf16.msra.mxu0 %v1159_v62 }
  0x39   :  { %1067 = vmatpush3.bf16.msra.mxu1 %v1160_v63  ;;  %1046 = vmatprep.subr.bf16.mxu0 %v1161_v0 }
  0x3a   :  { %1068 = vmatprep.subr.bf16.mxu1 %v1162_v1 }
  0x3c   :  { %1047 = vmatpush3.bf16.msra.mxu0 %v1163_v2 }
  0x3d   :  { %1069 = vmatpush3.bf16.msra.mxu1 %v1164_v3  ;;  %1048 = vmatprep.subr.bf16.mxu0 %v1165_v4 }
  0x3e   :  { %1070 = vmatprep.subr.bf16.mxu1 %v1166_v5 }
  0x40   :  { %1049 = vmatpush3.bf16.msra.mxu0 %v1167_v6 }
  0x41   :  { %12 = vsyncpa [#allocation3], 0  ;;  %1071 = vmatpush3.bf16.msra.mxu1 %v1168_v7  ;;  %v40_v14 = vpack.c.bf16 %v32_v12, %v32_v12  ;;  %v42_v15 = vpack.c.bf16 %v34_v13, %v34_v13  ;;  %675 = vmatprep.mubr.bf16.mxu0 %v41_v10  ;;  %v1195_v16 = vmov 0.0   ;;  %v727_v17 = vld [vmem:[%s1485_s3 + $0x18] sm:$0xff]  ;;  %v726_v18 = vld [vmem:[%s1485_s3 + $0x10] sm:$0xff]  ;;  %vm1196_vm0 = vmmov 0  }
  0x42   :  { %715 = vmatprep.mubr.bf16.mxu1 %v43_v11  ;;  %1085 = vmatprep.subr.mxu0 %v1195_v16  ;;  %897 = vst [vmem:[#allocation2] sm:$0xff] %v1195_v16  ;;  %v725_v19 = vld [vmem:[%s1485_s3 + $0x8] sm:$0xff]  ;;  %v724_v20 = vld [vmem:[%s1485_s3] sm:$0xff]  ;;  %vm735_vm1 = vcmask 261120   ;;  %s1197_s17 = smov 4   ;;  %vm823_vm2 = vcmask 64512  }
  0x43   :  { %676 = vmatmul.mubr.bf16.vlgmr.msra.gmra.mxu0 %v40_v14  ;;  %1096 = vmatprep.subr.mxu1 %v1195_v16  ;;  %v920_v30 = vld [vmem:[%s1484_s2] ss:$0 sm:$0xff]  ;;  %s1198_s19 = smov [#allocation2]   ;;  %vm898_vm3 = vcmask 31744   ;;  %vm904_vm4 = vcmask 97312  }
  0x44   :  { %716 = vmatmul.mubr.bf16.vlgmr.msra.gmra.mxu1 %v42_v15  ;;  %1086 = vmatpush3.msra.mxu0 %v727_v17  ;;  %v815_v47 = vld [vmem:[%s1487_s5] sm:$0xff]  ;;  %s912_s20 = sshll.u32 %s1198_s19, 4  ;;  %s913_s20 = int_to_ptr.vmem [resolvable:$true] %s912_s20 }
  0x45   :  { %1087 = vmatprep.subr.mxu0 %v1195_v16  ;;  %1093 = vmatprep.mubr.msk.f32.mxu0 %vm1196_vm0, %v1195_v16  ;;  %v985_v48 = vld [vmem:[%s1486_s4] ss:$0 sm:$0xff]  ;;  %s1173_s4 = scalar_lea.vmem %s913_s20, 128  ;;  %p1178_p1 = scmp.lt.s32.totalorder %s913_s20, %s913_s20 }
  0x46   :  { %1088 = vmatpush3.msra.mxu0 %v726_v18  ;;  %1098 = vmatprep.mubr.msk.f32.mxu1 %vm1196_vm0, %v1195_v16  ;;  %v988_v56 = vld [vmem:[%s1488_s6] ss:$0 sm:$0xff]  ;;  %p1174_p0 = scmp.ne.s32.totalorder %s913_s20, %s1173_s4  ;;  %p1179_p2 = scmp.lt.s32.totalorder %s1173_s4, %s1173_s4 }
  0x47   :  { %1089 = vmatprep.subr.mxu0 %v1195_v16  ;;  %1097 = vmatpush3.msra.mxu1 %v815_v47 }
  0x48   :  { %1090 = vmatpush3.msra.mxu0 %v725_v19  ;;  %p1180_p3 = por %p1179_p2, %p1178_p1 }
  0x49   :  { %1091 = vmatprep.subr.mxu0 %v1195_v16 }
  0x4a   :  { %1092 = vmatpush3.msra.mxu0 %v724_v20  ;;  %p1181_p4 = pnand %p1180_p3, %p1174_p0 }
  0xe3   :  { %v1006_v21 = vpop.f32.mrf.mxu0 }
  0xe4   :  { %v1028_v22 = vpop.f32.mrf.mxu1 }
  0xe5   :  { %v1007_v23 = vpop.f32.mrf.mxu0 }
  0xe6   :  { %v1029_v24 = vpop.f32.mrf.mxu1  ;;  %v1008_v29 = vadd.f32 %v1007_v23, %v1006_v21 }
  0xe7   :  { %v1009_v25 = vpop.f32.mrf.mxu0  ;;  %v1030_v32 = vadd.f32 %v1029_v24, %v1028_v22 }
  0xe8   :  { %v1031_v26 = vpop.f32.mrf.mxu1  ;;  %v598_v31 = vadd.f32 %v1008_v29, %v920_v30 }
  0xe9   :  { %v1010_v27 = vpop.f32.mrf.mxu0 }
  0xea   :  { %v1032_v28 = vpop.f32.mrf.mxu1  ;;  %v638_v36 = vadd.f32 %v1030_v32, %v598_v31 }
 0x103   :  { %v1050_v33 = vpop.f32.mrf.mxu0 }
 0x104   :  { %v1072_v34 = vpop.f32.mrf.mxu1 }
 0x105   :  { %v1051_v35 = vpop.f32.mrf.mxu0 }
 0x106   :  { %v1052_v37 = vadd.f32 %v1051_v35, %v1050_v33  ;;  %v1073_v38 = vpop.f32.mrf.mxu1 }
 0x107   :  { %v1053_v39 = vpop.f32.mrf.mxu0  ;;  %v1074_v41 = vadd.f32 %v1073_v38, %v1072_v34 }
 0x108   :  { %v678_v40 = vadd.f32 %v1052_v37, %v638_v36  ;;  %v1075_v42 = vpop.f32.mrf.mxu1 }
 0x109   :  { %v1054_v43 = vpop.f32.mrf.mxu0 }
 0x10a   :  { %v718_v44 = vadd.f32 %v1074_v41, %v678_v40  ;;  %v1076_v45 = vpop.f32.mrf.mxu1 }
 0x10c   :  { %v723_v46 = vmax.f32 %v718_v44, 0.0 }
 0x10e   :  { %1094 = vmatmul.mubr.msk.f32.vlgmr.msra.gmra.mxu0 %vm735_vm1, %v723_v46 }
 0x1ce   :  { %v805_v49 = vpop.f32.mrf.mxu0 }
 0x1cf   :  { %v806_v50 = vadd.f32 %v985_v48, %v805_v49 }
 0x1d0   :  { %v1095_v51 = vpop.f32.mrf.mxu0 }
 0x1d1   :  { %v987_v52 = vmul.f32 -1.442695, %v806_v50  ;;  %901 = vrot.lane.b32.xlu0 %v806_v50, %s1197_s17 }
 0x1d3   :  { %1169 = vpow2.f32 %v987_v52 }
 0x1e0   :  { %v1170_v53 = vpop.eup %1169 }
 0x1e1   :  { %v812_v54 = vadd.f32 1.0, %v1170_v53 }
 0x1e3   :  { %1171 = vrcp.f32 %v812_v54 }
 0x1f0   :  { %v1172_v55 = vpop.eup %1171 }
 0x1f1   :  { %1099 = vmatmul.mubr.msk.f32.vlgmr.msra.gmra.mxu1 %vm823_vm2, %v1172_v55 }
 0x243   :  { %v902_v60 = vpop.permute.xlu0 %901 }
 0x2b1   :  { %v893_v57 = vpop.f32.mrf.mxu1 }
 0x2b2   :  { %v894_v58 = vadd.f32 %v988_v56, %v893_v57 }
 0x2b3   :  { %v1100_v59 = vpop.f32.mrf.mxu1 }
 0x2b4   :  { %899 = vst.msk [vmem:[#allocation2] sm:$0xff] %vm898_vm3, %v894_v58 }
 0x2b5   :  { %905 = vst.msk [vmem:[#allocation2] sm:$0xff] %vm904_vm4, %v902_v60 }
 0x2b6   :  { %1184 = shalt.err (!%p1181_p4)
}
 0x2b7   :  { %915 = dma.vmem_to_hbm [thread:$0]  %s913_s20, 128, %s1489_s7, [#allocation3]  }
 0x2b8   :  { %1193 = dma.done.wait [#allocation3], 128  }
 0x2b9   :  { %1194 = vsyncadd [#allocation3], 4294967168 }
 0x2ba   :  { %919 = vsyncpa [#allocation3], 1 }

</bundles_post_ra>
